<compile_context>
chip_gen: v7x
topology: tpu7x:2x2x1
jax: 0.10.0
libtpu: 0.0.40
codegen_flags: <defaults>
</compile_context>

<pallas_src>
import jax
import jax.numpy as jnp
from jax.experimental import pallas as pl
from jax.experimental.pallas import tpu as pltpu

N_HIDDEN = 128


def _round_up(x, m):
    return ((x + m - 1) // m) * m


def _linear_relu_kernel(x_ref, w_ref, o_ref):
    # Single fused block-diagonal matmul + ReLU; everything resident in VMEM.
    z = jnp.dot(x_ref[...], w_ref[...], preferred_element_type=jnp.float32)  # MXU
    o_ref[...] = jnp.maximum(z, 0.0)                                         # VPU


def pack_params(weights, biases):
    """One-time parameter packing (do NOT call per forward pass).

    weights: list of [F_k, H] float32 (already transposed vs. torch Linear)
    biases:  list of [H] float32
    Returns W_big [F_pad, H] = vertical concat of [W_k; b_k] blocks, zero-padded
    so F_pad is a multiple of 128.
    """
    h = weights[0].shape[1]
    blocks = [jnp.concatenate([w, b.reshape(1, h)], axis=0)
              for w, b in zip(weights, biases)]
    w_big = jnp.concatenate(blocks, axis=0)
    f_total = w_big.shape[0]
    f_pad = _round_up(f_total, 128)
    return jnp.pad(w_big, ((0, f_pad - f_total), (0, 0)))


@jax.jit
def other_embedding(features, w_big):
    """Fused forward of Other_Embedding.

    features: tuple of [N_k, F_k] float32
    w_big:    [F_pad, H] packed parameters from pack_params()
    Returns a tuple of [N_k, H] activations, one per branch.
    """
    f_pad, h = w_big.shape

    # Build the block-diagonal input slab: each branch gets its own column
    # slab [F_k features | 1.0 bias column]; zeros everywhere else.
    rows = []
    col_off = 0
    for x in features:
        n_k, f_k = x.shape
        x_aug = jnp.concatenate([x, jnp.ones((n_k, 1), x.dtype)], axis=1)
        rows.append(jnp.pad(
            x_aug, ((0, 0), (col_off, f_pad - col_off - (f_k + 1)))))
        col_off += f_k + 1
    x_big = jnp.concatenate(rows, axis=0)

    n_total = x_big.shape[0]
    n_pad = _round_up(n_total, 8)
    x_big = jnp.pad(x_big, ((0, n_pad - n_total), (0, 0)))

    cost = pl.CostEstimate(
        flops=2 * n_pad * f_pad * h,
        transcendentals=0,
        bytes_accessed=4 * (x_big.size + w_big.size + n_pad * h),
    )

    out = pl.pallas_call(
        _linear_relu_kernel,
        out_shape=jax.ShapeDtypeStruct((n_pad, h), jnp.float32),
        grid=(1,),
        in_specs=[
            pl.BlockSpec((n_pad, f_pad), lambda i: (0, 0)),
            pl.BlockSpec((f_pad, h), lambda i: (0, 0)),
        ],
        out_specs=pl.BlockSpec((n_pad, h), lambda i: (0, 0)),
        compiler_params=pltpu.CompilerParams(
            dimension_semantics=("arbitrary",)),
        cost_estimate=cost,
    )(x_big, w_big)

    # Per-branch slices (static, fused under the same jit).
    outs = []
    row_off = 0
    for x in features:
        n_k = x.shape[0]
        outs.append(out[row_off:row_off + n_k, :])
        row_off += n_k
    return tuple(outs)


def _init_linear(key, in_features, out_features):
    # PyTorch nn.Linear default init: U(-1/sqrt(in), 1/sqrt(in)).
    kw, kb = jax.random.split(key)
    limit = 1.0 / (in_features ** 0.5)
    w = jax.random.uniform(kw, (in_features, out_features), jnp.float32,
                           -limit, limit)
    b = jax.random.uniform(kb, (out_features,), jnp.float32, -limit, limit)
    return w, b


if __name__ == "__main__":
    key = jax.random.PRNGKey(0)
    k_feat, k_param = jax.random.split(key)

    # Five entity types, each with its own (n_entities, in_features); the
    # module's hidden size is n_hidden = 128.
    branch_dims = {            # name: (n_rows, in_features)
        "disease": (12, 64),
        "mf": (20, 96),
        "bp": (24, 160),
        "cc": (16, 48),
        "pathway": (10, 10),   # identity features, as in the original script
    }

    kf = jax.random.split(k_feat, len(branch_dims))
    features = []
    for (name, (n, f)), kk in zip(branch_dims.items(), kf):
        if name == "pathway":
            features.append(jnp.eye(n, f, dtype=jnp.float32))
        else:
            features.append(jax.random.normal(kk, (n, f), jnp.float32))
    features = tuple(features)

    kp = jax.random.split(k_param, len(branch_dims))
    weights, biases = [], []
    for (name, (n, f)), kk in zip(branch_dims.items(), kp):
        w, b = _init_linear(kk, f, N_HIDDEN)
        weights.append(w)
        biases.append(b)

    # One-time parameter packing (outside the per-call path).
    w_big = pack_params(weights, biases)

    outs = other_embedding(features, w_big)
    jax.block_until_ready(outs)

    # Pure-JAX reference check.
    for x, w, b, o in zip(features, weights, biases, outs):
        ref = jnp.maximum(x @ w + b, 0.0)
        assert o.shape == ref.shape
        assert jnp.allclose(o, ref, atol=1e-4, rtol=1e-4)

    print("KERNEL_OK")
</pallas_src>

<mosaic_0001>
module attributes {stable_mosaic.version = 11 : i64} {
  func.func @_linear_relu_kernel(%arg0: i32, %arg1: memref<88x384xf32, #tpu.memory_space<vmem>>, %arg2: memref<384x128xf32, #tpu.memory_space<vmem>>, %arg3: memref<88x128xf32, #tpu.memory_space<vmem>>) attributes {dimension_semantics = [#tpu.dimension_semantics<arbitrary>], iteration_bounds = array<i64: 1>, scalar_prefetch = 0 : i64, scratch_operands = 0 : i64, tpu.core_type = #tpu.core_type<tc>, window_params = [{pipeline_mode = #tpu.pipeline_mode<synchronous>, transform_indices = @transform_0, window_bounds = array<i64: 88, 384>}, {pipeline_mode = #tpu.pipeline_mode<synchronous>, transform_indices = @transform_1, window_bounds = array<i64: 384, 128>}, {pipeline_mode = #tpu.pipeline_mode<synchronous>, transform_indices = @transform_2, window_bounds = array<i64: 88, 128>}]} {
    %c0 = arith.constant 0 : index
    %c0_0 = arith.constant 0 : index
    %0 = vector.load %arg1[%c0, %c0_0] : memref<88x384xf32, #tpu.memory_space<vmem>>, vector<88x384xf32>
    %c0_1 = arith.constant 0 : index
    %c0_2 = arith.constant 0 : index
    %1 = vector.load %arg2[%c0_1, %c0_2] : memref<384x128xf32, #tpu.memory_space<vmem>>, vector<384x128xf32>
    %cst = arith.constant dense<0.000000e+00> : vector<88x128xf32>
    %2 = tpu.matmul %0, %1, %cst {dimension_numbers = #tpu.dot_dimension_numbers<[1], [0], [0], [1], [0, 0, 1, 1], [], []>} : vector<88x384xf32>, vector<384x128xf32>, vector<88x128xf32> -> vector<88x128xf32>
    %cst_3 = arith.constant 0.000000e+00 : f32
    %3 = vector.broadcast %cst_3 : f32 to vector<88x128xf32>
    %4 = arith.maximumf %2, %3 : vector<88x128xf32>
    %c0_4 = arith.constant 0 : index
    %c0_5 = arith.constant 0 : index
    %5 = vector.load %arg3[%c0_4, %c0_5] : memref<88x128xf32, #tpu.memory_space<vmem>>, vector<88x128xf32>
    tpu.vector_store %arg3[%c0_4, %c0_5], %4 {strides = array<i32>} : memref<88x128xf32, #tpu.memory_space<vmem>>, vector<88x128xf32>,
    return
  }
  func.func @transform_0(%arg0: i32) -> (i32, i32) {
    %c0_i32 = arith.constant 0 : i32
    %c0_i32_0 = arith.constant 0 : i32
    %c0_i32_1 = arith.constant 0 : i32
    return %c0_i32, %c0_i32_0 : i32, i32
  }
  func.func @transform_1(%arg0: i32) -> (i32, i32) {
    %c0_i32 = arith.constant 0 : i32
    %c0_i32_0 = arith.constant 0 : i32
    %c0_i32_1 = arith.constant 0 : i32
    return %c0_i32, %c0_i32_0 : i32, i32
  }
  func.func @transform_2(%arg0: i32) -> (i32, i32) {
    %c0_i32 = arith.constant 0 : i32
    %c0_i32_0 = arith.constant 0 : i32
    %c0_i32_1 = arith.constant 0 : i32
    return %c0_i32, %c0_i32_0 : i32, i32
  }
}

</mosaic_0001>

<bundles_post_ra>
// kernel: other_embedding.1
= control target key start
LH: loop header
LB: loop body
LE: loop exit
PB: predicated region body
PF: predicated region fallthrough
CT: control target
= control target key end

     0   :  { %v574_v3 = vmov 0.0|0.0   ;;  %vm575_vm0 = vmmov 0   ;;  %v576_v4 = vmov 0.0   ;;  %s898_s1 = inlined_call_operand.vmem [shape: f32[384,128], index: 1, kind: input, shape index: {}]   ;;  %s899_s0 = inlined_call_operand.vmem [shape: f32[88,384], index: 0, kind: input, shape index: {}]   ;;  %s900_s2 = inlined_call_operand.vmem [shape: f32[88,128], index: 2, kind: output, shape index: {}]  }
   0x1   :  { %v60_v0 = vld [vmem:[%s898_s1 + $0x80] sm:$0xff]  ;;  %v61_v1 = vld [vmem:[%s898_s1 + $0x88] sm:$0xff]  ;;  %547 = vmatprep.subr.bf16.mxu1 %v574_v3  ;;  %482 = vmatprep.mubr.msk.f32.mxu1 %vm575_vm0, %v576_v4  ;;  %v62_v11 = vld [vmem:[%s898_s1 + $0x90] sm:$0xff] }
   0x2   :  { %v44_v2 = vld [vmem:[%s898_s1] sm:$0xff]  ;;  %v515_v5 = vpack.c.bf16 %v61_v1, %v60_v0  ;;  %v45_v6 = vld [vmem:[%s898_s1 + $0x8] sm:$0xff]  ;;  %v63_v12 = vld [vmem:[%s898_s1 + $0x98] sm:$0xff] }
   0x3   :  { %v76_v7 = vld [vmem:[%s898_s1 + $0x100] sm:$0xff]  ;;  %v77_v8 = vld [vmem:[%s898_s1 + $0x108] sm:$0xff]  ;;  %v517_v9 = vpack.c.bf16 %v45_v6, %v44_v2  ;;  %v46_v13 = vld [vmem:[%s898_s1 + $0x10] sm:$0xff]  ;;  %v519_v14 = vpack.c.bf16 %v63_v12, %v62_v11 }
   0x4   :  { %v548_v10 = vpack.c.bf16 %v77_v8, %v76_v7  ;;  %516 = vmatprep.subr.bf16.mxu0 %v515_v5  ;;  %v47_v15 = vld [vmem:[%s898_s1 + $0x18] sm:$0xff]  ;;  %v78_v16 = vld [vmem:[%s898_s1 + $0x110] sm:$0xff]  ;;  %v64_v20 = vld [vmem:[%s898_s1 + $0xa0] sm:$0xff] }
   0x5   :  { %v79_v17 = vld [vmem:[%s898_s1 + $0x118] sm:$0xff]  ;;  %518 = vmatpush3.bf16.msra.mxu0 %v517_v9  ;;  %v521_v18 = vpack.c.bf16 %v47_v15, %v46_v13  ;;  %v65_v21 = vld [vmem:[%s898_s1 + $0xa8] sm:$0xff]  ;;  %v48_v22 = vld [vmem:[%s898_s1 + $0x20] sm:$0xff] }
   0x6   :  { %549 = vmatpush3.bf16.msra.mxu1 %v548_v10  ;;  %v551_v19 = vpack.c.bf16 %v79_v17, %v78_v16  ;;  %520 = vmatprep.subr.bf16.mxu0 %v519_v14  ;;  %v523_v23 = vpack.c.bf16 %v65_v21, %v64_v20  ;;  %v49_v24 = vld [vmem:[%s898_s1 + $0x28] sm:$0xff]  ;;  %v80_v25 = vld [vmem:[%s898_s1 + $0x120] sm:$0xff]  ;;  %v66_v27 = vld [vmem:[%s898_s1 + $0xb0] sm:$0xff] }
   0x7   :  { %550 = vmatprep.subr.bf16.mxu1 %v574_v3  ;;  %v81_v26 = vld [vmem:[%s898_s1 + $0x128] sm:$0xff]  ;;  %v67_v28 = vld [vmem:[%s898_s1 + $0xb8] sm:$0xff]  ;;  %v525_v29 = vpack.c.bf16 %v49_v24, %v48_v22  ;;  %v50_v31 = vld [vmem:[%s898_s1 + $0x30] sm:$0xff] }
   0x8   :  { %v554_v30 = vpack.c.bf16 %v81_v26, %v80_v25  ;;  %v527_v32 = vpack.c.bf16 %v67_v28, %v66_v27  ;;  %v51_v33 = vld [vmem:[%s898_s1 + $0x38] sm:$0xff]  ;;  %v82_v34 = vld [vmem:[%s898_s1 + $0x130] sm:$0xff]  ;;  %v68_v36 = vld [vmem:[%s898_s1 + $0xc0] sm:$0xff] }
   0x9   :  { %522 = vmatpush3.bf16.msra.mxu0 %v521_v18  ;;  %v83_v35 = vld [vmem:[%s898_s1 + $0x138] sm:$0xff]  ;;  %v69_v37 = vld [vmem:[%s898_s1 + $0xc8] sm:$0xff]  ;;  %v529_v38 = vpack.c.bf16 %v51_v33, %v50_v31  ;;  %v52_v40 = vld [vmem:[%s898_s1 + $0x40] sm:$0xff] }
   0xa   :  { %552 = vmatpush3.bf16.msra.mxu1 %v551_v19  ;;  %524 = vmatprep.subr.bf16.mxu0 %v523_v23  ;;  %v557_v39 = vpack.c.bf16 %v83_v35, %v82_v34  ;;  %v531_v41 = vpack.c.bf16 %v69_v37, %v68_v36  ;;  %v53_v42 = vld [vmem:[%s898_s1 + $0x48] sm:$0xff]  ;;  %v84_v43 = vld [vmem:[%s898_s1 + $0x140] sm:$0xff]  ;;  %v70_v45 = vld [vmem:[%s898_s1 + $0xd0] sm:$0xff] }
   0xb   :  { %553 = vmatprep.subr.bf16.mxu1 %v574_v3  ;;  %v85_v44 = vld [vmem:[%s898_s1 + $0x148] sm:$0xff]  ;;  %v71_v46 = vld [vmem:[%s898_s1 + $0xd8] sm:$0xff]  ;;  %v533_v48 = vpack.c.bf16 %v53_v42, %v52_v40  ;;  %v54_v50 = vld [vmem:[%s898_s1 + $0x50] sm:$0xff] }
   0xc   :  { %v12_v47 = vld [vmem:[%s899_s0 + $0x8] sm:$0xff]  ;;  %v560_v49 = vpack.c.bf16 %v85_v44, %v84_v43  ;;  %v535_v51 = vpack.c.bf16 %v71_v46, %v70_v45  ;;  %v55_v52 = vld [vmem:[%s898_s1 + $0x58] sm:$0xff]  ;;  %v86_v53 = vld [vmem:[%s898_s1 + $0x150] sm:$0xff] }
   0xd   :  { %526 = vmatpush3.bf16.msra.mxu0 %v525_v29  ;;  %v87_v54 = vld [vmem:[%s898_s1 + $0x158] sm:$0xff]  ;;  %v72_v55 = vld [vmem:[%s898_s1 + $0xe0] sm:$0xff]  ;;  %v73_v56 = vld [vmem:[%s898_s1 + $0xe8] sm:$0xff]  ;;  %156 = vmatprep.mubr.f32.mxu0 %v12_v47  ;;  %v537_v57 = vpack.c.bf16 %v55_v52, %v54_v50 }
   0xe   :  { %555 = vmatpush3.bf16.msra.mxu1 %v554_v30  ;;  %528 = vmatprep.subr.bf16.mxu0 %v527_v32  ;;  %v563_v58 = vpack.c.bf16 %v87_v54, %v86_v53  ;;  %v56_v59 = vld [vmem:[%s898_s1 + $0x60] sm:$0xff]  ;;  %v539_v60 = vpack.c.bf16 %v73_v56, %v72_v55  ;;  %v57_v61 = vld [vmem:[%s898_s1 + $0x68] sm:$0xff]  ;;  %v74_v0 = vld [vmem:[%s898_s1 + $0xf0] sm:$0xff] }
   0xf   :  { %556 = vmatprep.subr.bf16.mxu1 %v574_v3  ;;  %v88_v62 = vld [vmem:[%s898_s1 + $0x160] sm:$0xff]  ;;  %v89_v63 = vld [vmem:[%s898_s1 + $0x168] sm:$0xff]  ;;  %v75_v1 = vld [vmem:[%s898_s1 + $0xf8] sm:$0xff]  ;;  %v541_v2 = vpack.c.bf16 %v57_v61, %v56_v59 }
  0x10   :  { %v566_v5 = vpack.c.bf16 %v89_v63, %v88_v62  ;;  %v58_v6 = vld [vmem:[%s898_s1 + $0x70] sm:$0xff]  ;;  %v543_v7 = vpack.c.bf16 %v75_v1, %v74_v0  ;;  %v59_v8 = vld [vmem:[%s898_s1 + $0x78] sm:$0xff]  ;;  %v11_v13 = vld [vmem:[%s899_s0] sm:$0xff] }
  0x11   :  { %530 = vmatpush3.bf16.msra.mxu0 %v529_v38  ;;  %v90_v9 = vld [vmem:[%s898_s1 + $0x170] sm:$0xff]  ;;  %v91_v10 = vld [vmem:[%s898_s1 + $0x178] sm:$0xff]  ;;  %v545_v11 = vpack.c.bf16 %v59_v8, %v58_v6  ;;  %v15_v15 = vld [vmem:[%s899_s0 + $0x20] sm:$0xff] }
  0x12   :  { %558 = vmatpush3.bf16.msra.mxu1 %v557_v39  ;;  %532 = vmatprep.subr.bf16.mxu0 %v531_v41  ;;  %v569_v12 = vpack.c.bf16 %v91_v10, %v90_v9  ;;  %v13_v14 = vld [vmem:[%s899_s0 + $0x10] sm:$0xff]  ;;  %v16_v16 = vld [vmem:[%s899_s0 + $0x28] sm:$0xff]  ;;  %v18_v17 = vld [vmem:[%s899_s0 + $0x38] sm:$0xff] }
  0x13   :  { %559 = vmatprep.subr.bf16.mxu1 %v574_v3  ;;  %v17_v18 = vld [vmem:[%s899_s0 + $0x30] sm:$0xff]  ;;  %v19_v19 = vld [vmem:[%s899_s0 + $0x40] sm:$0xff]  ;;  %v20_v21 = vld [vmem:[%s899_s0 + $0x48] sm:$0xff] }
  0x14   :  { %v21_v20 = vld [vmem:[%s899_s0 + $0x50] sm:$0xff]  ;;  %v22_v22 = vld [vmem:[%s899_s0 + $0x58] sm:$0xff]  ;;  %v24_v23 = vld [vmem:[%s899_s0 + $0x68] sm:$0xff] }
  0x15   :  { %534 = vmatpush3.bf16.msra.mxu0 %v533_v48  ;;  %v23_v24 = vld [vmem:[%s899_s0 + $0x60] sm:$0xff]  ;;  %v25_v25 = vld [vmem:[%s899_s0 + $0x70] sm:$0xff]  ;;  %v26_v27 = vld [vmem:[%s899_s0 + $0x78] sm:$0xff] }
  0x16   :  { %561 = vmatpush3.bf16.msra.mxu1 %v560_v49  ;;  %536 = vmatprep.subr.bf16.mxu0 %v535_v51  ;;  %v27_v26 = vld [vmem:[%s899_s0 + $0x80] sm:$0xff]  ;;  %v28_v28 = vld [vmem:[%s899_s0 + $0x88] sm:$0xff]  ;;  %v30_v29 = vld [vmem:[%s899_s0 + $0x98] sm:$0xff] }
  0x17   :  { %562 = vmatprep.subr.bf16.mxu1 %v574_v3  ;;  %v29_v30 = vld [vmem:[%s899_s0 + $0x90] sm:$0xff]  ;;  %v31_v31 = vld [vmem:[%s899_s0 + $0xa0] sm:$0xff]  ;;  %v32_v33 = vld [vmem:[%s899_s0 + $0xa8] sm:$0xff] }
  0x18   :  { %v33_v32 = vld [vmem:[%s899_s0 + $0xb0] sm:$0xff]  ;;  %v34_v34 = vld [vmem:[%s899_s0 + $0xb8] sm:$0xff]  ;;  %v36_v35 = vld [vmem:[%s899_s0 + $0xc8] sm:$0xff] }
  0x19   :  { %538 = vmatpush3.bf16.msra.mxu0 %v537_v57  ;;  %v35_v36 = vld [vmem:[%s899_s0 + $0xc0] sm:$0xff]  ;;  %v37_v37 = vld [vmem:[%s899_s0 + $0xd0] sm:$0xff]  ;;  %v38_v39 = vld [vmem:[%s899_s0 + $0xd8] sm:$0xff] }
  0x1a   :  { %564 = vmatpush3.bf16.msra.mxu1 %v563_v58  ;;  %540 = vmatprep.subr.bf16.mxu0 %v539_v60  ;;  %v39_v38 = vld [vmem:[%s899_s0 + $0xe0] sm:$0xff]  ;;  %v40_v40 = vld [vmem:[%s899_s0 + $0xe8] sm:$0xff]  ;;  %v42_v41 = vld [vmem:[%s899_s0 + $0xf8] sm:$0xff] }
  0x1b   :  { %565 = vmatprep.subr.bf16.mxu1 %v574_v3  ;;  %v41_v42 = vld [vmem:[%s899_s0 + $0xf0] sm:$0xff]  ;;  %v43_v43 = vld [vmem:[%s899_s0 + $0x100] sm:$0xff] }
  0x1d   :  { %542 = vmatpush3.bf16.msra.mxu0 %v541_v2 }
  0x1e   :  { %567 = vmatpush3.bf16.msra.mxu1 %v566_v5  ;;  %544 = vmatprep.subr.bf16.mxu0 %v543_v7 }
  0x1f   :  { %568 = vmatprep.subr.bf16.mxu1 %v574_v3  ;;  %v14_v3 = vld [vmem:[%s899_s0 + $0x18] sm:$0xff] }
  0x21   :  { %546 = vmatpush3.bf16.msra.mxu0 %v545_v11 }
  0x22   :  { %570 = vmatpush3.bf16.msra.mxu1 %v569_v12 }
  0x24   :  { %157 = vmatmul.mubr.f32.vlgmr.msra.gmra.mrb[0].mxu0 %v11_v13 }
  0x25   :  { %483 = vmatmul.mubr.f32.vlgmr.msra.gmra.mrb[0].mxu1 %v13_v14  ;;  %161 = vmatprep.mubr.f32.mxu0 %v15_v15 }
  0x26   :  { %485 = vmatprep.mubr.msk.f32.mxu1 %vm575_vm0, %v576_v4 }
  0x28   :  { %162 = vmatmul.mubr.f32.gmra.mrb[2].mxu0 %v14_v3 }
  0x29   :  { %486 = vmatmul.mubr.f32.gmra.mrb[2].mxu1 %v16_v16  ;;  %166 = vmatprep.mubr.f32.mxu0 %v18_v17 }
  0x2a   :  { %488 = vmatprep.mubr.msk.f32.mxu1 %vm575_vm0, %v576_v4 }
  0x2c   :  { %167 = vmatmul.mubr.f32.gmra.mrb[4].mxu0 %v17_v18 }
  0x2d   :  { %489 = vmatmul.mubr.f32.gmra.mrb[4].mxu1 %v19_v19  ;;  %171 = vmatprep.mubr.f32.mxu0 %v21_v20 }
  0x2e   :  { %491 = vmatprep.mubr.msk.f32.mxu1 %vm575_vm0, %v576_v4 }
  0x30   :  { %172 = vmatmul.mubr.f32.gmra.mrb[6].mxu0 %v20_v21 }
  0x31   :  { %492 = vmatmul.mubr.f32.gmra.mrb[6].mxu1 %v22_v22  ;;  %176 = vmatprep.mubr.f32.mxu0 %v24_v23 }
  0x32   :  { %494 = vmatprep.mubr.msk.f32.mxu1 %vm575_vm0, %v576_v4 }
  0x34   :  { %177 = vmatmul.mubr.f32.gmra.mrb[8].mxu0 %v23_v24 }
  0x35   :  { %495 = vmatmul.mubr.f32.gmra.mrb[8].mxu1 %v25_v25  ;;  %181 = vmatprep.mubr.f32.mxu0 %v27_v26 }
  0x36   :  { %497 = vmatprep.mubr.msk.f32.mxu1 %vm575_vm0, %v576_v4 }
  0x38   :  { %182 = vmatmul.mubr.f32.gmra.mrb[10].mxu0 %v26_v27 }
  0x39   :  { %498 = vmatmul.mubr.f32.gmra.mrb[10].mxu1 %v28_v28  ;;  %186 = vmatprep.mubr.f32.mxu0 %v30_v29 }
  0x3a   :  { %500 = vmatprep.mubr.msk.f32.mxu1 %vm575_vm0, %v576_v4 }
  0x3c   :  { %187 = vmatmul.mubr.f32.gmra.mrb[12].mxu0 %v29_v30 }
  0x3d   :  { %501 = vmatmul.mubr.f32.gmra.mrb[12].mxu1 %v31_v31  ;;  %191 = vmatprep.mubr.f32.mxu0 %v33_v32 }
  0x3e   :  { %503 = vmatprep.mubr.msk.f32.mxu1 %vm575_vm0, %v576_v4 }
  0x40   :  { %192 = vmatmul.mubr.f32.gmra.mrb[14].mxu0 %v32_v33 }
  0x41   :  { %504 = vmatmul.mubr.f32.gmra.mrb[14].mxu1 %v34_v34  ;;  %196 = vmatprep.mubr.f32.mxu0 %v36_v35 }
  0x42   :  { %506 = vmatprep.mubr.msk.f32.mxu1 %vm575_vm0, %v576_v4 }
  0x44   :  { %197 = vmatmul.mubr.f32.gmra.mrb[16].mxu0 %v35_v36 }
  0x45   :  { %507 = vmatmul.mubr.f32.gmra.mrb[16].mxu1 %v37_v37  ;;  %201 = vmatprep.mubr.f32.mxu0 %v39_v38 }
  0x46   :  { %509 = vmatprep.mubr.msk.f32.mxu1 %vm575_vm0, %v576_v4 }
  0x48   :  { %202 = vmatmul.mubr.f32.gmra.mrb[18].mxu0 %v38_v39 }
  0x49   :  { %510 = vmatmul.mubr.f32.gmra.mrb[18].mxu1 %v40_v40  ;;  %206 = vmatprep.mubr.f32.mxu0 %v42_v41 }
  0x4a   :  { %512 = vmatprep.mubr.msk.f32.mxu1 %vm575_vm0, %v576_v4 }
  0x4c   :  { %207 = vmatmul.mubr.f32.gmra.mrb[20].mxu0 %v41_v42 }
  0x4d   :  { %513 = vmatmul.mubr.f32.gmra.mrb[20].mxu1 %v43_v43 }
  0xf7   :  { %v390_v44 = vpop.f32.mrb[0].mxu0 }
  0xf8   :  { %v278_v45 = vpop.f32.mrb[0].mxu1  ;;  %v391_v46 = vpop.f32.mrb[1].mxu0 }
  0xf9   :  { %v484_v47 = vpop.f32.mrb[1].mxu1  ;;  %v392_v48 = vadd.f32 %v391_v46, %v390_v44 }
  0xfb   :  { %v279_v49 = vadd.f32 %v392_v48, %v278_v45  ;;  %v393_v50 = vpop.f32.mrb[2].mxu0 }
  0xfc   :  { %v283_v51 = vpop.f32.mrb[2].mxu1  ;;  %v394_v52 = vpop.f32.mrb[3].mxu0 }
  0xfd   :  { %v487_v53 = vpop.f32.mrb[3].mxu1  ;;  %v332_v54 = vmax.f32 %v279_v49, 0.0  ;;  %v395_v55 = vadd.f32 %v394_v52, %v393_v50 }
  0xff   :  { %343 = vst [vmem:[%s900_s2] sm:$0xff] %v332_v54  ;;  %v284_v4 = vadd.f32 %v395_v55, %v283_v51  ;;  %v396_v56 = vpop.f32.mrb[4].mxu0 }
 0x100   :  { %v288_v57 = vpop.f32.mrb[4].mxu1  ;;  %v397_v58 = vpop.f32.mrb[5].mxu0 }
 0x101   :  { %v490_v59 = vpop.f32.mrb[5].mxu1  ;;  %v333_v60 = vmax.f32 %v284_v4, 0.0  ;;  %v398_v61 = vadd.f32 %v397_v58, %v396_v56 }
 0x103   :  { %344 = vst [vmem:[%s900_s2 + $0x8] sm:$0xff] %v333_v60  ;;  %v289_v62 = vadd.f32 %v398_v61, %v288_v57  ;;  %v399_v63 = vpop.f32.mrb[6].mxu0 }
 0x104   :  { %v293_v0 = vpop.f32.mrb[6].mxu1  ;;  %v400_v1 = vpop.f32.mrb[7].mxu0 }
 0x105   :  { %v493_v2 = vpop.f32.mrb[7].mxu1  ;;  %v334_v5 = vmax.f32 %v289_v62, 0.0  ;;  %v401_v6 = vadd.f32 %v400_v1, %v399_v63 }
 0x107   :  { %345 = vst [vmem:[%s900_s2 + $0x10] sm:$0xff] %v334_v5  ;;  %v294_v7 = vadd.f32 %v401_v6, %v293_v0  ;;  %v402_v8 = vpop.f32.mrb[8].mxu0 }
 0x108   :  { %v298_v9 = vpop.f32.mrb[8].mxu1  ;;  %v403_v10 = vpop.f32.mrb[9].mxu0 }
 0x109   :  { %v496_v11 = vpop.f32.mrb[9].mxu1  ;;  %v335_v12 = vmax.f32 %v294_v7, 0.0  ;;  %v404_v13 = vadd.f32 %v403_v10, %v402_v8 }
 0x10b   :  { %346 = vst [vmem:[%s900_s2 + $0x18] sm:$0xff] %v335_v12  ;;  %v299_v14 = vadd.f32 %v404_v13, %v298_v9  ;;  %v405_v15 = vpop.f32.mrb[10].mxu0 }
 0x10c   :  { %v303_v3 = vpop.f32.mrb[10].mxu1  ;;  %v406_v16 = vpop.f32.mrb[11].mxu0 }
 0x10d   :  { %v499_v17 = vpop.f32.mrb[11].mxu1  ;;  %v336_v18 = vmax.f32 %v299_v14, 0.0  ;;  %v407_v19 = vadd.f32 %v406_v16, %v405_v15 }
 0x10f   :  { %347 = vst [vmem:[%s900_s2 + $0x20] sm:$0xff] %v336_v18  ;;  %v304_v20 = vadd.f32 %v407_v19, %v303_v3  ;;  %v408_v21 = vpop.f32.mrb[12].mxu0 }
 0x110   :  { %v308_v22 = vpop.f32.mrb[12].mxu1  ;;  %v409_v23 = vpop.f32.mrb[13].mxu0 }
 0x111   :  { %v502_v24 = vpop.f32.mrb[13].mxu1  ;;  %v337_v25 = vmax.f32 %v304_v20, 0.0  ;;  %v410_v26 = vadd.f32 %v409_v23, %v408_v21 }
 0x113   :  { %348 = vst [vmem:[%s900_s2 + $0x28] sm:$0xff] %v337_v25  ;;  %v309_v27 = vadd.f32 %v410_v26, %v308_v22  ;;  %v411_v28 = vpop.f32.mrb[14].mxu0 }
 0x114   :  { %v313_v29 = vpop.f32.mrb[14].mxu1  ;;  %v412_v30 = vpop.f32.mrb[15].mxu0 }
 0x115   :  { %v505_v31 = vpop.f32.mrb[15].mxu1  ;;  %v338_v32 = vmax.f32 %v309_v27, 0.0  ;;  %v413_v33 = vadd.f32 %v412_v30, %v411_v28 }
 0x117   :  { %349 = vst [vmem:[%s900_s2 + $0x30] sm:$0xff] %v338_v32  ;;  %v314_v34 = vadd.f32 %v413_v33, %v313_v29  ;;  %v414_v35 = vpop.f32.mrb[16].mxu0 }
 0x118   :  { %v318_v36 = vpop.f32.mrb[16].mxu1  ;;  %v415_v37 = vpop.f32.mrb[17].mxu0 }
 0x119   :  { %v508_v38 = vpop.f32.mrb[17].mxu1  ;;  %v339_v39 = vmax.f32 %v314_v34, 0.0  ;;  %v416_v40 = vadd.f32 %v415_v37, %v414_v35 }
 0x11b   :  { %350 = vst [vmem:[%s900_s2 + $0x38] sm:$0xff] %v339_v39  ;;  %v319_v41 = vadd.f32 %v416_v40, %v318_v36  ;;  %v417_v42 = vpop.f32.mrb[18].mxu0 }
 0x11c   :  { %v323_v43 = vpop.f32.mrb[18].mxu1  ;;  %v418_v44 = vpop.f32.mrb[19].mxu0 }
 0x11d   :  { %v511_v45 = vpop.f32.mrb[19].mxu1  ;;  %v340_v46 = vmax.f32 %v319_v41, 0.0  ;;  %v419_v47 = vadd.f32 %v418_v44, %v417_v42 }
 0x11f   :  { %351 = vst [vmem:[%s900_s2 + $0x40] sm:$0xff] %v340_v46  ;;  %v324_v48 = vadd.f32 %v419_v47, %v323_v43  ;;  %v420_v49 = vpop.f32.mrb[20].mxu0 }
 0x120   :  { %v328_v50 = vpop.f32.mrb[20].mxu1  ;;  %v421_v51 = vpop.f32.mrb[21].mxu0 }
 0x121   :  { %v514_v52 = vpop.f32.mrb[21].mxu1  ;;  %v341_v53 = vmax.f32 %v324_v48, 0.0  ;;  %v422_v54 = vadd.f32 %v421_v51, %v420_v49 }
 0x123   :  { %352 = vst [vmem:[%s900_s2 + $0x48] sm:$0xff] %v341_v53  ;;  %v329_v55 = vadd.f32 %v422_v54, %v328_v50 }
 0x125   :  { %v342_v4 = vmax.f32 %v329_v55, 0.0 }
 0x127   :  { %353 = vst [vmem:[%s900_s2 + $0x50] sm:$0xff] %v342_v4 }

</bundles_post_ra>
